<compile_context>
chip_gen: v6e
topology: v6e:2x2x1
jax: 0.10.0
libtpu: 0.0.40
codegen_flags: <defaults>
</compile_context>

<pallas_src>
import functools
import math

import jax
import jax.numpy as jnp
from jax.experimental import pallas as pl
from jax.experimental.pallas import tpu as pltpu


def _bcae_combine_kernel(clf_ref, reg_ref, out_ref, *, threshold):
    clf = clf_ref[...]
    reg = reg_ref[...]
    # exp in the input precision (weak-typed constants avoid an f32 upcast).
    transformed = jnp.exp(reg) * 6.0 + 64.0
    # Multiply by the mask (not jnp.where) to match PyTorch's `x * bool`
    # semantics, including Inf * 0 -> NaN propagation.
    mask = (clf > threshold).astype(transformed.dtype)
    out_ref[...] = (transformed * mask).astype(out_ref.dtype)


_DENSE_LANE_CANDIDATES = (4096, 2048, 1024, 512, 256, 128)


def _pick_cols(n):
    """Factor n into (rows, cols).  Returns (cols, pad); pad > 0 only on the
    rare last-resort path."""
    # 1) Widest lane-dense (multiple of 128) divisor: fully unmasked stores.
    for c in _DENSE_LANE_CANDIDATES:
        if n % c == 0:
            return c, 0
    # 2) Largest divisor in [128, 4096]: only the last partial vreg per row is
    #    masked, and there is zero extra HBM traffic (reshape of a contiguous
    #    array is free).
    for c in range(min(4096, n), 127, -1):
        if n % c == 0:
            return c, 0
    # 3) Last resort: pad the flat array up to a multiple of 128.
    # TODO(synk): element counts with no divisor >= 128 (prime-ish) still take
    # a padded copy; an in-kernel ragged 1-D tail would remove it.
    cols = 128
    rows = pl.cdiv(n, cols)
    return cols, rows * cols - n


def bcae_combine(clf_input, reg_input, threshold=0.5, *,
                 target_block_bytes=4 << 20):
    assert clf_input.shape == reg_input.shape
    assert clf_input.dtype == reg_input.dtype
    orig_shape = clf_input.shape
    dtype = clf_input.dtype
    itemsize = jnp.dtype(dtype).itemsize
    n = math.prod(orig_shape)

    cols, pad = _pick_cols(n)
    rows = (n + pad) // cols
    if pad:
        clf2 = jnp.pad(clf_input.reshape(-1), (0, pad)).reshape(rows, cols)
        reg2 = jnp.pad(reg_input.reshape(-1), (0, pad)).reshape(rows, cols)
    else:
        clf2 = clf_input.reshape(rows, cols)
        reg2 = reg_input.reshape(rows, cols)

    # ---- Row tiling ------------------------------------------------------
    sublane = 16 if itemsize == 2 else 8          # packed-dtype sublane quantum
    bytes_per_row = cols * itemsize
    total_bytes = rows * bytes_per_row

    if total_bytes <= (256 << 10) or rows <= sublane:
        # Small tensor: one block; per-grid-step overhead would dominate any
        # megacore-sharding win.
        tile_rows = rows
    else:
        # Biggest block under target_block_bytes, but always >= 2 blocks (and
        # an even count when possible) so v7x's two TensorCores both get work
        # under dimension_semantics=("parallel",).
        max_rows = max(sublane,
                       (target_block_bytes // bytes_per_row) // sublane * sublane)
        num_blocks = max(2, pl.cdiv(rows, max_rows))
        num_blocks += num_blocks % 2
        tile_rows = min(rows,
                        pl.cdiv(pl.cdiv(rows, num_blocks), sublane) * sublane)

    grid = (pl.cdiv(rows, tile_rows),)            # ragged tail handled by Pallas

    # 3 arrays x 2 pipeline buffers of the actual block, plus headroom for
    # Mosaic scratch.  Explicit so bigger tiles stay safe on v5e's 16 MiB
    # scoped default and under v7x's 64 MiB physical VMEM.
    block_bytes = tile_rows * cols * itemsize
    vmem_limit = int(min(6 * block_bytes + (8 << 20), 64 << 20))

    kernel = functools.partial(_bcae_combine_kernel, threshold=float(threshold))

    out_flat = pl.pallas_call(
        kernel,
        out_shape=jax.ShapeDtypeStruct((rows, cols), dtype),
        grid_spec=pltpu.PrefetchScalarGridSpec(
            num_scalar_prefetch=0,
            grid=grid,
            in_specs=[
                pl.BlockSpec((tile_rows, cols), lambda i: (i, 0)),
                pl.BlockSpec((tile_rows, cols), lambda i: (i, 0)),
            ],
            out_specs=pl.BlockSpec((tile_rows, cols), lambda i: (i, 0)),
        ),
        compiler_params=pltpu.CompilerParams(
            dimension_semantics=("parallel",),
            vmem_limit_bytes=vmem_limit,
        ),
    )(clf2, reg2)

    if pad:
        return out_flat.reshape(-1)[:n].reshape(orig_shape)
    return out_flat.reshape(orig_shape)


def _reference(clf, reg, thr):
    return (jnp.exp(reg) * 6.0 + 64.0) * (clf > thr).astype(reg.dtype)


if __name__ == "__main__":
    key = jax.random.PRNGKey(0)
    k1, k2, k3, k4, k5, k6, k7, k8 = jax.random.split(key, 8)

    # 1) Primary small NCHW case consistent with the module: batch=2, ch=4, 16x16.
    shape = (2, 4, 16, 16)
    clf = jax.random.uniform(k1, shape, dtype=jnp.float32)
    reg = jax.random.normal(k2, shape, dtype=jnp.float32) * 0.5
    out = jax.block_until_ready(bcae_combine(clf, reg, threshold=0.5))
    assert out.shape == shape and out.dtype == clf.dtype
    assert jnp.allclose(out, _reference(clf, reg, 0.5), rtol=1e-6, atol=1e-5), \
        "mismatch vs reference (primary case)"

    # 2) Multi-block grid (2 even blocks -> both v7x TensorCores busy).
    shape2 = (2, 4, 128, 128)
    clf2 = jax.random.uniform(k3, shape2, dtype=jnp.float32)
    reg2 = jax.random.normal(k4, shape2, dtype=jnp.float32) * 0.5
    out2 = jax.block_until_ready(bcae_combine(clf2, reg2, threshold=0.5))
    assert jnp.allclose(out2, _reference(clf2, reg2, 0.5), rtol=1e-6, atol=1e-5), \
        "mismatch vs reference (multi-block case)"

    # 3) Element count not a multiple of 128 -> divisor path, no pad/slice copies.
    shape3 = (3, 5, 24, 40)          # 14400 elements -> (4, 3600) view
    clf3 = jax.random.uniform(k5, shape3, dtype=jnp.float32)
    reg3 = jax.random.normal(k6, shape3, dtype=jnp.float32) * 0.5
    out3 = jax.block_until_ready(bcae_combine(clf3, reg3, threshold=0.5))
    assert jnp.allclose(out3, _reference(clf3, reg3, 0.5), rtol=1e-6, atol=1e-5), \
        "mismatch vs reference (divisor-path case)"

    # 4) Last-resort padded path (no divisor >= 128).
    shape4 = (1, 1, 7, 17)           # 119 elements
    clf4 = jax.random.uniform(k7, shape4, dtype=jnp.float32)
    reg4 = jax.random.normal(k8, shape4, dtype=jnp.float32) * 0.5
    out4 = jax.block_until_ready(bcae_combine(clf4, reg4, threshold=0.5))
    assert jnp.allclose(out4, _reference(clf4, reg4, 0.5), rtol=1e-6, atol=1e-5), \
        "mismatch vs reference (pad last-resort case)"

    print("KERNEL_OK")
</pallas_src>

<mosaic_0001>
module attributes {stable_mosaic.version = 11 : i64} {
  func.func @_bcae_combine_kernel(%arg0: i32, %arg1: memref<1x2048xf32, #tpu.memory_space<vmem>>, %arg2: memref<1x2048xf32, #tpu.memory_space<vmem>>, %arg3: memref<1x2048xf32, #tpu.memory_space<vmem>>) attributes {dimension_semantics = [#tpu.dimension_semantics<parallel>], iteration_bounds = array<i64: 1>, scalar_prefetch = 0 : i64, scratch_operands = 0 : i64, tpu.core_type = #tpu.core_type<tc>, window_params = [{transform_indices = @transform_0, window_bounds = array<i64: 1, 2048>}, {transform_indices = @transform_1, window_bounds = array<i64: 1, 2048>}, {transform_indices = @transform_2, window_bounds = array<i64: 1, 2048>}]} {
    %c0 = arith.constant 0 : index
    %c0_0 = arith.constant 0 : index
    %0 = vector.load %arg1[%c0, %c0_0] : memref<1x2048xf32, #tpu.memory_space<vmem>>, vector<1x2048xf32>
    %c0_1 = arith.constant 0 : index
    %c0_2 = arith.constant 0 : index
    %1 = vector.load %arg2[%c0_1, %c0_2] : memref<1x2048xf32, #tpu.memory_space<vmem>>, vector<1x2048xf32>
    %2 = math.exp %1 : vector<1x2048xf32>
    %cst = arith.constant 6.000000e+00 : f32
    %3 = vector.broadcast %cst : f32 to vector<1x2048xf32>
    %4 = arith.mulf %2, %3 : vector<1x2048xf32>
    %cst_3 = arith.constant 6.400000e+01 : f32
    %5 = vector.broadcast %cst_3 : f32 to vector<1x2048xf32>
    %6 = arith.addf %4, %5 : vector<1x2048xf32>
    %cst_4 = arith.constant 5.000000e-01 : f32
    %7 = vector.broadcast %cst_4 : f32 to vector<1x2048xf32>
    %8 = arith.cmpf ogt, %0, %7 : vector<1x2048xf32>
    %9 = arith.extui %8 : vector<1x2048xi1> to vector<1x2048xi32>
    %10 = arith.sitofp %9 : vector<1x2048xi32> to vector<1x2048xf32>
    %11 = arith.mulf %6, %10 : vector<1x2048xf32>
    %c0_5 = arith.constant 0 : index
    %c0_6 = arith.constant 0 : index
    %12 = vector.load %arg3[%c0_5, %c0_6] : memref<1x2048xf32, #tpu.memory_space<vmem>>, vector<1x2048xf32>
    tpu.vector_store %arg3[%c0_5, %c0_6], %11 {strides = array<i32>} : memref<1x2048xf32, #tpu.memory_space<vmem>>, vector<1x2048xf32>,
    return
  }
  func.func @transform_0(%arg0: i32) -> (i32, i32) {
    %c0_i32 = arith.constant 0 : i32
    %c0_i32_0 = arith.constant 0 : i32
    return %arg0, %c0_i32 : i32, i32
  }
  func.func @transform_1(%arg0: i32) -> (i32, i32) {
    %c0_i32 = arith.constant 0 : i32
    %c0_i32_0 = arith.constant 0 : i32
    return %arg0, %c0_i32 : i32, i32
  }
  func.func @transform_2(%arg0: i32) -> (i32, i32) {
    %c0_i32 = arith.constant 0 : i32
    %c0_i32_0 = arith.constant 0 : i32
    return %arg0, %c0_i32 : i32, i32
  }
}

</mosaic_0001>

<bundles_post_ra>
// kernel: tpu_custom_call.1
= control target key start
LH: loop header
LB: loop body
LE: loop exit
PB: predicated region body
PF: predicated region fallthrough
CT: control target
= control target key end

     0   :  { %7 = vsyncpa [#allocation3], 0  ;;  %s178_s0 = inlined_call_operand.hbm [shape: f32[1,2048], index: 0, kind: input, shape index: {}]   ;;  %s179_s1 = inlined_call_operand.hbm [shape: f32[1,2048], index: 1, kind: input, shape index: {}]   ;;  %s180_s2 = inlined_call_operand.hbm [shape: f32[1,2048], index: 2, kind: output, shape index: {}]  }
   0x1   :  { %8 = vsyncpa [#allocation6], 0 }
   0x2   :  { %9 = vsyncpa [#allocation4], 0  ;;  %s150_s9 = smov [#allocation2]   ;;  %s151_s11 = smov [#allocation5]  }
   0x3   :  { %s16_s10 = sshll.u32 %s150_s9, 4  ;;  %s26_s12 = sshll.u32 %s151_s11, 4  ;;  %s17_s10 = int_to_ptr.vmem [resolvable:$true] %s16_s10  ;;  %s27_s12 = int_to_ptr.vmem [resolvable:$true] %s26_s12 }
   0x4   :  { %s92_s13 = scalar_lea.vmem %s17_s10, 256  ;;  %p97_p1 = scmp.lt.s32.totalorder %s17_s10, %s17_s10 }
   0x5   :  { %p93_p0 = scmp.ne.s32.totalorder %s17_s10, %s92_s13  ;;  %p98_p2 = scmp.lt.s32.totalorder %s92_s13, %s92_s13 }
   0x7   :  { %p99_p3 = por %p98_p2, %p97_p1 }
   0x9   :  { %p100_p4 = pnand %p99_p3, %p93_p0 }
   0xb   :  { %103 = shalt.err (!%p100_p4)
}
   0xc   :  { %19 = dma.hbm_to_vmem [thread:$0]  %s178_s0, 256, %s17_s10, [#allocation3]  }
   0xd   :  { %s112_s16 = scalar_lea.vmem %s27_s12, 256  ;;  %p117_p6 = scmp.lt.s32.totalorder %s27_s12, %s27_s12 }
   0xe   :  { %p113_p5 = scmp.ne.s32.totalorder %s27_s12, %s112_s16  ;;  %p118_p7 = scmp.lt.s32.totalorder %s112_s16, %s112_s16 }
  0x10   :  { %p119_p8 = por %p118_p7, %p117_p6 }
  0x12   :  { %p120_p9 = pnand %p119_p8, %p113_p5 }
  0x14   :  { %123 = shalt.err (!%p120_p9)
}
  0x15   :  { %29 = dma.hbm_to_vmem [thread:$0]  %s179_s1, 256, %s27_s12, [#allocation6]  }
  0x16   :  { %144 = dma.done.wait [#allocation3], 256  }
  0x17   :  { %145 = vsyncadd [#allocation3], 4294967040 }
  0x18   :  { %146 = dma.done.wait [#allocation6], 256  }
  0x19   :  { %147 = vsyncadd [#allocation6], 4294967040  ;;  %v38_v0 = vld [vmem:[#allocation5] sm:$0xff]  ;;  %v39_v2 = vld [vmem:[#allocation5 + $0x8] sm:$0xff]  ;;  %v152_v9 = vmov 0.0   ;;  %s153_s0 = smov [#allocation7]  }
  0x1a   :  { %v40_v1 = vmul.f32 1.442695, %v38_v0  ;;  %v42_v3 = vmul.f32 1.442695, %v39_v2  ;;  %v36_v4 = vld [vmem:[#allocation2] sm:$0xff]  ;;  %v37_v5 = vld [vmem:[#allocation2 + $0x8] sm:$0xff] }
  0x1b   :  { %vm48_vm0 = vcmp.gt.f32.partialorder %v36_v4, 0.5  ;;  %vm49_vm1 = vcmp.gt.f32.partialorder %v37_v5, 0.5  ;;  %s64_s1 = sshll.u32 %s153_s0, 4  ;;  %s65_s1 = int_to_ptr.vmem [resolvable:$true] %s64_s1 }
  0x1c   :  { %80 = vpow2.f32 %v40_v1  ;;  %v74_v10 = vsel %vm48_vm0, 1.0, %v152_v9  ;;  %v75_v13 = vsel %vm49_vm1, 1.0, %v152_v9  ;;  %s124_s19 = scalar_lea.vmem %s65_s1, 256  ;;  %p129_p11 = scmp.lt.s32.totalorder %s65_s1, %s65_s1 }
  0x1d   :  { %82 = vpow2.f32 %v42_v3  ;;  %p125_p10 = scmp.ne.s32.totalorder %s65_s1, %s124_s19  ;;  %p130_p12 = scmp.lt.s32.totalorder %s124_s19, %s124_s19 }
  0x1f   :  { %p131_p13 = por %p130_p12, %p129_p11 }
  0x21   :  { %p132_p0 = pnand %p131_p13, %p125_p10 }
  0x29   :  { %v81_v6 = vpop.eup %80 }
  0x2a   :  { %v83_v7 = vpop.eup %82  ;;  %v44_v8 = vmul.f32 6.0, %v81_v6 }
  0x2b   :  { %v45_v11 = vmul.f32 6.0, %v83_v7 }
  0x2c   :  { %v46_v12 = vadd.f32 64.0, %v44_v8 }
  0x2d   :  { %v47_v14 = vadd.f32 64.0, %v45_v11 }
  0x2e   :  { %v54_v15 = vmul.f32 %v74_v10, %v46_v12 }
  0x2f   :  { %v55_v16 = vmul.f32 %v75_v13, %v47_v14 }
  0x30   :  { %56 = vst [vmem:[#allocation7] sm:$0xff] %v54_v15 }
  0x31   :  { %57 = vst [vmem:[#allocation7 + $0x8] sm:$0xff] %v55_v16 }
  0x32   :  { %135 = shalt.err (!%p132_p0)
}
  0x33   :  { %67 = dma.vmem_to_hbm [thread:$0]  %s65_s1, 256, %s180_s2, [#allocation4]  }
  0x34   :  { %148 = dma.done.wait [#allocation4], 256  }
  0x35   :  { %149 = vsyncadd [#allocation4], 4294967040 }
  0x36   :  { %71 = vsyncpa [#allocation3], 1 }
  0x37   :  { %72 = vsyncpa [#allocation6], 1 }
  0x38   :  { %73 = vsyncpa [#allocation4], 1 }

</bundles_post_ra>
